<compile_context>
chip_gen: v7x
topology: tpu7x:2x2x1
jax: 0.10.0
libtpu: 0.0.40
codegen_flags: <defaults>
</compile_context>

<pallas_src>
import math

import jax
import jax.numpy as jnp
from jax.experimental import pallas as pl
from jax.experimental.pallas import tpu as pltpu

LN_EPS = 1e-5


def _round_up(x, m):
    return ((x + m - 1) // m) * m


def _layernorm_onepass(x, gamma, beta):
    """One-pass LayerNorm (f32 stats): var = E[x^2] - mean^2, clamped >= 0."""
    mean = jnp.mean(x, axis=-1, keepdims=True)
    meansq = jnp.mean(x * x, axis=-1, keepdims=True)
    var = jnp.maximum(meansq - mean * mean, 0.0)
    return (x - mean) * jax.lax.rsqrt(var + LN_EPS) * gamma + beta


# ----------------------------- fused Pallas kernel -------------------------- #

def _make_fused_kernel(num_layers, shortcut_flags, channels, out_pad, mm_dtype):
    """Build the fused backbone + decoder kernel.

    Ref order (inputs):
      x        : [tb, in_channels] f32 (encoder output tile)
      vecs     : [n_rows, W] f32, rows = per layer (b1,g1,be1,b2,g2,be2[,bs])
                 then decoder (gamma, beta, bias)
      per layer: w1cat ([cin, 2C] bf16 if shortcut else [cin, C]), w2 ([C, C])
      decoder  : w_dec [C, out_pad] bf16
    Output: o_ref (lane-padded [tb, out_pad] f32).
    """

    def kernel(*refs):
        x_ref, vecs_ref = refs[0], refs[1]
        w_refs = refs[2:-1]
        o_ref = refs[-1]

        vecs = vecs_ref[...]                       # [n_rows, W] f32
        x = x_ref[...]                             # [tb, in_channels] f32

        def vrow(r, width):
            return vecs[r:r + 1, :width]           # static slice -> [1, width]

        r = 0
        wi = 0
        for li in range(num_layers):
            has_sc = shortcut_flags[li]
            w1 = w_refs[wi][...]                   # bf16
            w2 = w_refs[wi + 1][...]               # bf16
            wi += 2
            b1 = vrow(r, channels)
            g1 = vrow(r + 1, channels)
            be1 = vrow(r + 2, channels)
            b2 = vrow(r + 3, channels)
            g2 = vrow(r + 4, channels)
            be2 = vrow(r + 5, channels)
            r += 6
            if has_sc:
                bs = vrow(r, channels)
                r += 1

            # lin1 (+ fused shortcut projection): one MXU dot, bf16 operands,
            # f32 accumulation.
            h_all = jnp.dot(x.astype(mm_dtype), w1,
                            preferred_element_type=jnp.float32)
            if has_sc:
                h = h_all[:, :channels] + b1
                sc = h_all[:, channels:2 * channels] + bs
            else:
                h = h_all + b1
                sc = x

            h = _layernorm_onepass(h, g1, be1)
            h = jnp.maximum(h, 0.0)
            # dropout(p=0.2) = identity (eval mode)
            h = jnp.dot(h.astype(mm_dtype), w2,
                        preferred_element_type=jnp.float32) + b2
            h = _layernorm_onepass(h, g2, be2)
            h = jnp.maximum(h, 0.0)
            x = h + sc

        # Decoder: LayerNorm -> ReLU -> Linear (output lane-padded to 128).
        g = vrow(r, channels)
        be = vrow(r + 1, channels)
        b_dec = vrow(r + 2, out_pad)
        w_dec = w_refs[wi][...]
        h = _layernorm_onepass(x, g, be)
        h = jnp.maximum(h, 0.0)
        out = jnp.dot(h.astype(mm_dtype), w_dec,
                      preferred_element_type=jnp.float32) + b_dec
        o_ref[...] = out.astype(o_ref.dtype)

    return kernel


# ------------------------------ Pallas wrapper ------------------------------ #

def resnet_forward(x_num, params, *, matmul_dtype=jnp.bfloat16):
    """Full ResNet forward.

    x_num: [B, num_cols] numerical feature columns.
    Returns [B, out_channels] (f32).
    """
    B, num_cols = x_num.shape
    enc_w, enc_b = params["enc_w"], params["enc_b"]          # [num_cols, channels]
    channels = enc_w.shape[1]
    in_channels = num_cols * channels
    out_channels = params["decoder"]["w"].shape[1]
    out_pad = _round_up(out_channels, 128)                   # lane-dense store
    W = max(channels, out_pad)                               # packed-vector width
    num_layers = len(params["blocks"])

    # ---- Encoder affine + flatten in plain XLA (tiny elementwise op). This
    # avoids shipping an O(num_cols^2*channels) mostly-zero block-diagonal
    # matmul weight into VMEM.
    x_enc = (x_num[:, :, None] * enc_w[None] + enc_b[None]).reshape(B, in_channels)
    x_enc = x_enc.astype(jnp.float32)

    # ---- Pack parameters.
    def to_mm(w):
        return w.astype(matmul_dtype)

    weights = []
    vec_rows = []
    shortcut_flags = []

    def add_vec(v):
        v = v.reshape(1, -1).astype(jnp.float32)
        vec_rows.append(jnp.pad(v, ((0, 0), (0, W - v.shape[1]))))

    for blk in params["blocks"]:
        has_sc = "ws" in blk
        shortcut_flags.append(has_sc)
        w1 = jnp.concatenate([blk["w1"], blk["ws"]], axis=1) if has_sc else blk["w1"]
        weights.append(to_mm(w1))
        weights.append(to_mm(blk["w2"]))
        for name in ("b1", "g1", "be1", "b2", "g2", "be2"):
            add_vec(blk[name])
        if has_sc:
            add_vec(blk["bs"])

    dec = params["decoder"]
    add_vec(dec["g"])
    add_vec(dec["be"])
    w_dec = jnp.pad(dec["w"], ((0, 0), (0, out_pad - out_channels)))
    weights.append(to_mm(w_dec))
    add_vec(jnp.pad(dec["b"], ((0, 0), (0, out_pad - out_channels))))

    vecs = jnp.concatenate(vec_rows, axis=0)
    pad_rows = (-vecs.shape[0]) % 8                          # sublane-align
    if pad_rows:
        vecs = jnp.pad(vecs, ((0, pad_rows), (0, 0)))

    # ---- Batch tiling: balanced tiles (no ~2x padding blowup) and >= 2 grid
    # steps when B > 8 so both v7x TensorCores get work.
    num_tiles = max(pl.cdiv(B, 512), 2 if B > 8 else 1)
    tb = _round_up(pl.cdiv(B, num_tiles), 8)

    # ---- VMEM sizing: derate the batch tile / set vmem_limit_bytes against the
    # actual VMEM capacity (assume v7x's 64 MiB if the query is unavailable).
    try:
        vmem_cap = max(int(pltpu.get_tpu_info().vmem_capacity_bytes), 32 * 2**20)
    except Exception:
        vmem_cap = 64 * 2**20

    weight_bytes = (sum(int(w.size) * w.dtype.itemsize for w in weights)
                    + int(vecs.size) * 4)
    max_width = max(in_channels, 2 * channels, out_pad)

    def vmem_estimate(tb_):
        # 2x: default double-buffered pipeline buffers; + f32 temporaries.
        return (2 * weight_bytes
                + 2 * tb_ * in_channels * 4
                + 2 * tb_ * out_pad * 4
                + 8 * tb_ * max_width * 4)

    budget = int(vmem_cap * 0.6)
    while vmem_estimate(tb) > budget and tb > 8:
        tb = max(8, _round_up(tb // 2, 8))
    vmem_limit = int(min(vmem_cap * 0.85,
                         max(32 * 2**20, 2 * vmem_estimate(tb))))

    B_pad = _round_up(B, tb)
    grid = (B_pad // tb,)
    x_pad = jnp.pad(x_enc, ((0, B_pad - B), (0, 0))) if B_pad != B else x_enc

    # ---- Specs: x/out tiled over batch; all weights grid-invariant (constant
    # index_map -> DMA'd once, VMEM-resident across the batch grid).
    def const_spec(shape):
        return pl.BlockSpec(shape, lambda i: (0, 0))

    in_specs = [pl.BlockSpec((tb, in_channels), lambda i: (i, 0)),
                const_spec(vecs.shape)]
    in_specs += [const_spec(w.shape) for w in weights]

    kernel = _make_fused_kernel(num_layers, tuple(shortcut_flags), channels,
                                out_pad, matmul_dtype)

    out = pl.pallas_call(
        kernel,
        out_shape=jax.ShapeDtypeStruct((B_pad, out_pad), jnp.float32),
        grid_spec=pltpu.PrefetchScalarGridSpec(
            num_scalar_prefetch=0,
            grid=grid,
            in_specs=in_specs,
            out_specs=pl.BlockSpec((tb, out_pad), lambda i: (i, 0)),
        ),
        compiler_params=pltpu.CompilerParams(
            dimension_semantics=("parallel",),
            vmem_limit_bytes=vmem_limit,
        ),
    )(x_pad, vecs, *weights)

    return out[:B, :out_channels]


# ------------------------------ parameter init ------------------------------ #

def _linear_init(key, fan_in, fan_out, dtype=jnp.float32):
    """PyTorch Linear default init: U(-1/sqrt(fan_in), 1/sqrt(fan_in))."""
    kw, kb = jax.random.split(key)
    bound = 1.0 / math.sqrt(fan_in)
    w = jax.random.uniform(kw, (fan_in, fan_out), dtype, -bound, bound)
    b = jax.random.uniform(kb, (1, fan_out), dtype, -bound, bound)
    return w, b


def make_params(key, *, channels, out_channels, num_layers, num_cols,
                dtype=jnp.float32):
    keys = jax.random.split(key, 2 + 3 * num_layers + 1)
    ki = iter(keys)

    # Numerical LinearEncoder: weight/bias of shape [num_cols, channels]
    enc_w = jax.random.normal(next(ki), (num_cols, channels), dtype) * 0.1
    enc_b = jax.random.normal(next(ki), (num_cols, channels), dtype) * 0.1

    in_channels = channels * num_cols
    blocks = []
    for i in range(num_layers):
        cin = in_channels if i == 0 else channels
        w1, b1 = _linear_init(next(ki), cin, channels, dtype)
        w2, b2 = _linear_init(next(ki), channels, channels, dtype)
        blk = {
            "w1": w1, "b1": b1,
            "g1": jnp.ones((1, channels), dtype), "be1": jnp.zeros((1, channels), dtype),
            "w2": w2, "b2": b2,
            "g2": jnp.ones((1, channels), dtype), "be2": jnp.zeros((1, channels), dtype),
        }
        if cin != channels:
            ws, bs = _linear_init(next(ki), cin, channels, dtype)
            blk["ws"], blk["bs"] = ws, bs
        else:
            _ = next(ki)  # keep key schedule deterministic regardless of shortcut
        blocks.append(blk)

    wd, bd = _linear_init(next(ki), channels, out_channels, dtype)
    dec = {
        "g": jnp.ones((1, channels), dtype), "be": jnp.zeros((1, channels), dtype),
        "w": wd, "b": bd,
    }
    return {"enc_w": enc_w, "enc_b": enc_b, "blocks": blocks, "decoder": dec}


# -------------------------------- reference --------------------------------- #

def resnet_reference(x_num, params, matmul_dtype=jnp.float32):
    """Pure-JAX reference (PyTorch-style two-pass LayerNorm).

    matmul_dtype=jnp.bfloat16 mirrors the kernel's matmul numerics exactly;
    matmul_dtype=jnp.float32 is the full-precision PyTorch-equivalent forward.
    """
    def mm(a, w):
        return jnp.dot(a.astype(matmul_dtype), w.astype(matmul_dtype),
                       preferred_element_type=jnp.float32)

    def ln(x, g, b):
        mean = jnp.mean(x, -1, keepdims=True)
        var = jnp.mean((x - mean) ** 2, -1, keepdims=True)
        return (x - mean) * jax.lax.rsqrt(var + LN_EPS) * g + b

    x = x_num[:, :, None] * params["enc_w"][None] + params["enc_b"][None]
    x = x.reshape(x.shape[0], -1).astype(jnp.float32)
    for blk in params["blocks"]:
        h = mm(x, blk["w1"]) + blk["b1"]
        h = ln(h, blk["g1"], blk["be1"])
        h = jnp.maximum(h, 0.0)
        h = mm(h, blk["w2"]) + blk["b2"]
        h = ln(h, blk["g2"], blk["be2"])
        h = jnp.maximum(h, 0.0)
        sc = mm(x, blk["ws"]) + blk["bs"] if "ws" in blk else x
        x = h + sc
    d = params["decoder"]
    h = ln(x, d["g"], d["be"])
    h = jnp.maximum(h, 0.0)
    return mm(h, d["w"]) + d["b"]


if __name__ == "__main__":
    # Small, deterministic setup: batch=16, 4 numerical columns,
    # channels=32, num_layers=3, out_channels=8.
    B, NUM_COLS, CHANNELS, NUM_LAYERS, OUT_CHANNELS = 16, 4, 32, 3, 8

    key = jax.random.PRNGKey(0)
    k_x, k_p = jax.random.split(key)
    x_num = jax.random.normal(k_x, (B, NUM_COLS), jnp.float32)
    params = make_params(k_p, channels=CHANNELS, out_channels=OUT_CHANNELS,
                         num_layers=NUM_LAYERS, num_cols=NUM_COLS)

    fwd = jax.jit(resnet_forward)
    out = jax.block_until_ready(fwd(x_num, params))

    assert out.shape == (B, OUT_CHANNELS)
    assert bool(jnp.all(jnp.isfinite(out)))

    # Tight check vs a reference that mirrors the kernel's matmul numerics
    # (bf16 operands, f32 accumulation, f32 LN).
    ref_mm = jax.block_until_ready(
        resnet_reference(x_num, params, matmul_dtype=jnp.bfloat16))
    assert jnp.allclose(out, ref_mm, atol=5e-3, rtol=5e-3), \
        "mismatch vs bf16-matmul reference"

    # Loose check vs the full-f32 PyTorch-equivalent forward (bf16 matmul
    # operands introduce ~0.2% relative error per dot).
    ref_f32 = jax.block_until_ready(
        resnet_reference(x_num, params, matmul_dtype=jnp.float32))
    assert jnp.allclose(out, ref_f32, atol=1e-1, rtol=1e-1), \
        "mismatch vs f32 reference"

    print("KERNEL_OK")
</pallas_src>

<mosaic_0001>
module attributes {stable_mosaic.version = 11 : i64} {
  func.func @kernel(%arg0: i32, %arg1: memref<8x128xf32, #tpu.memory_space<vmem>>, %arg2: memref<24x128xf32, #tpu.memory_space<vmem>>, %arg3: memref<128x64xbf16, #tpu.memory_space<vmem>>, %arg4: memref<32x32xbf16, #tpu.memory_space<vmem>>, %arg5: memref<32x32xbf16, #tpu.memory_space<vmem>>, %arg6: memref<32x32xbf16, #tpu.memory_space<vmem>>, %arg7: memref<32x32xbf16, #tpu.memory_space<vmem>>, %arg8: memref<32x32xbf16, #tpu.memory_space<vmem>>, %arg9: memref<32x128xbf16, #tpu.memory_space<vmem>>, %arg10: memref<8x128xf32, #tpu.memory_space<vmem>>) attributes {dimension_semantics = [#tpu.dimension_semantics<parallel>], iteration_bounds = array<i64: 2>, scalar_prefetch = 0 : i64, scratch_operands = 0 : i64, tpu.core_type = #tpu.core_type<tc>, window_params = [{transform_indices = @transform_0, window_bounds = array<i64: 8, 128>}, {pipeline_mode = #tpu.pipeline_mode<synchronous>, transform_indices = @transform_1, window_bounds = array<i64: 24, 128>}, {pipeline_mode = #tpu.pipeline_mode<synchronous>, transform_indices = @transform_2, window_bounds = array<i64: 128, 64>}, {pipeline_mode = #tpu.pipeline_mode<synchronous>, transform_indices = @transform_3, window_bounds = array<i64: 32, 32>}, {pipeline_mode = #tpu.pipeline_mode<synchronous>, transform_indices = @transform_4, window_bounds = array<i64: 32, 32>}, {pipeline_mode = #tpu.pipeline_mode<synchronous>, transform_indices = @transform_5, window_bounds = array<i64: 32, 32>}, {pipeline_mode = #tpu.pipeline_mode<synchronous>, transform_indices = @transform_6, window_bounds = array<i64: 32, 32>}, {pipeline_mode = #tpu.pipeline_mode<synchronous>, transform_indices = @transform_7, window_bounds = array<i64: 32, 32>}, {pipeline_mode = #tpu.pipeline_mode<synchronous>, transform_indices = @transform_8, window_bounds = array<i64: 32, 128>}, {transform_indices = @transform_9, window_bounds = array<i64: 8, 128>}]} {
    %c0 = arith.constant 0 : index
    %c0_0 = arith.constant 0 : index
    %0 = vector.load %arg2[%c0, %c0_0] : memref<24x128xf32, #tpu.memory_space<vmem>>, vector<24x128xf32>
    %c0_1 = arith.constant 0 : index
    %c0_2 = arith.constant 0 : index
    %1 = vector.load %arg1[%c0_1, %c0_2] : memref<8x128xf32, #tpu.memory_space<vmem>>, vector<8x128xf32>
    %c0_3 = arith.constant 0 : index
    %c0_4 = arith.constant 0 : index
    %2 = vector.load %arg3[%c0_3, %c0_4] : memref<128x64xbf16, #tpu.memory_space<vmem>>, vector<128x64xbf16>
    %c0_5 = arith.constant 0 : index
    %c0_6 = arith.constant 0 : index
    %3 = vector.load %arg4[%c0_5, %c0_6] : memref<32x32xbf16, #tpu.memory_space<vmem>>, vector<32x32xbf16>
    %4 = vector.extract_strided_slice %0 {offsets = [0, 0], sizes = [1, 32], strides = [1, 1]} : vector<24x128xf32> to vector<1x32xf32>
    %5 = vector.extract_strided_slice %0 {offsets = [1, 0], sizes = [1, 32], strides = [1, 1]} : vector<24x128xf32> to vector<1x32xf32>
    %6 = vector.extract_strided_slice %0 {offsets = [2, 0], sizes = [1, 32], strides = [1, 1]} : vector<24x128xf32> to vector<1x32xf32>
    %7 = vector.extract_strided_slice %0 {offsets = [3, 0], sizes = [1, 32], strides = [1, 1]} : vector<24x128xf32> to vector<1x32xf32>
    %8 = vector.extract_strided_slice %0 {offsets = [4, 0], sizes = [1, 32], strides = [1, 1]} : vector<24x128xf32> to vector<1x32xf32>
    %9 = vector.extract_strided_slice %0 {offsets = [5, 0], sizes = [1, 32], strides = [1, 1]} : vector<24x128xf32> to vector<1x32xf32>
    %10 = vector.extract_strided_slice %0 {offsets = [6, 0], sizes = [1, 32], strides = [1, 1]} : vector<24x128xf32> to vector<1x32xf32>
    %11 = arith.truncf %1 : vector<8x128xf32> to vector<8x128xbf16>
    %cst = arith.constant dense<0.000000e+00> : vector<8x64xf32>
    %12 = tpu.matmul %11, %2, %cst {dimension_numbers = #tpu.dot_dimension_numbers<[1], [0], [0], [1], [0, 0, 1, 1], [], []>} : vector<8x128xbf16>, vector<128x64xbf16>, vector<8x64xf32> -> vector<8x64xf32>
    %13 = vector.extract_strided_slice %12 {offsets = [0, 0], sizes = [8, 32], strides = [1, 1]} : vector<8x64xf32> to vector<8x32xf32>
    %14 = vector.broadcast %4 : vector<1x32xf32> to vector<8x32xf32>
    %15 = arith.addf %13, %14 : vector<8x32xf32>
    %16 = vector.extract_strided_slice %12 {offsets = [0, 32], sizes = [8, 32], strides = [1, 1]} : vector<8x64xf32> to vector<8x32xf32>
    %17 = vector.broadcast %10 : vector<1x32xf32> to vector<8x32xf32>
    %18 = arith.addf %16, %17 : vector<8x32xf32>
    %cst_7 = arith.constant dense<0.000000e+00> : vector<8xf32>
    %19 = vector.multi_reduction <add>, %15, %cst_7 [1] : vector<8x32xf32> to vector<8xf32>
    %20 = vector.shape_cast %19 : vector<8xf32> to vector<8x1xf32>
    %cst_8 = arith.constant 3.200000e+01 : f32
    %21 = vector.broadcast %cst_8 : f32 to vector<8x1xf32>
    %22 = arith.divf %20, %21 : vector<8x1xf32>
    %23 = arith.mulf %15, %15 : vector<8x32xf32>
    %cst_9 = arith.constant dense<0.000000e+00> : vector<8xf32>
    %24 = vector.multi_reduction <add>, %23, %cst_9 [1] : vector<8x32xf32> to vector<8xf32>
    %25 = vector.shape_cast %24 : vector<8xf32> to vector<8x1xf32>
    %cst_10 = arith.constant 3.200000e+01 : f32
    %26 = vector.broadcast %cst_10 : f32 to vector<8x1xf32>
    %27 = arith.divf %25, %26 : vector<8x1xf32>
    %28 = arith.mulf %22, %22 : vector<8x1xf32>
    %29 = arith.subf %27, %28 : vector<8x1xf32>
    %cst_11 = arith.constant 0.000000e+00 : f32
    %30 = vector.broadcast %cst_11 : f32 to vector<8x1xf32>
    %31 = arith.maximumf %29, %30 : vector<8x1xf32>
    %32 = vector.broadcast %22 : vector<8x1xf32> to vector<8x32xf32>
    %33 = arith.subf %15, %32 : vector<8x32xf32>
    %cst_12 = arith.constant 9.99999974E-6 : f32
    %34 = vector.broadcast %cst_12 : f32 to vector<8x1xf32>
    %35 = arith.addf %31, %34 : vector<8x1xf32>
    %36 = math.rsqrt %35 : vector<8x1xf32>
    %37 = vector.broadcast %36 : vector<8x1xf32> to vector<8x32xf32>
    %38 = arith.mulf %33, %37 : vector<8x32xf32>
    %39 = vector.broadcast %5 : vector<1x32xf32> to vector<8x32xf32>
    %40 = arith.mulf %38, %39 : vector<8x32xf32>
    %41 = vector.broadcast %6 : vector<1x32xf32> to vector<8x32xf32>
    %42 = arith.addf %40, %41 : vector<8x32xf32>
    %cst_13 = arith.constant 0.000000e+00 : f32
    %43 = vector.broadcast %cst_13 : f32 to vector<8x32xf32>
    %44 = arith.maximumf %42, %43 : vector<8x32xf32>
    %45 = arith.truncf %44 : vector<8x32xf32> to vector<8x32xbf16>
    %cst_14 = arith.constant dense<0.000000e+00> : vector<8x32xf32>
    %46 = tpu.matmul %45, %3, %cst_14 {dimension_numbers = #tpu.dot_dimension_numbers<[1], [0], [0], [1], [0, 0, 1, 1], [], []>} : vector<8x32xbf16>, vector<32x32xbf16>, vector<8x32xf32> -> vector<8x32xf32>
    %47 = vector.broadcast %7 : vector<1x32xf32> to vector<8x32xf32>
    %48 = arith.addf %46, %47 : vector<8x32xf32>
    %cst_15 = arith.constant dense<0.000000e+00> : vector<8xf32>
    %49 = vector.multi_reduction <add>, %48, %cst_15 [1] : vector<8x32xf32> to vector<8xf32>
    %50 = vector.shape_cast %49 : vector<8xf32> to vector<8x1xf32>
    %cst_16 = arith.constant 3.200000e+01 : f32
    %51 = vector.broadcast %cst_16 : f32 to vector<8x1xf32>
    %52 = arith.divf %50, %51 : vector<8x1xf32>
    %53 = arith.mulf %48, %48 : vector<8x32xf32>
    %cst_17 = arith.constant dense<0.000000e+00> : vector<8xf32>
    %54 = vector.multi_reduction <add>, %53, %cst_17 [1] : vector<8x32xf32> to vector<8xf32>
    %55 = vector.shape_cast %54 : vector<8xf32> to vector<8x1xf32>
    %cst_18 = arith.constant 3.200000e+01 : f32
    %56 = vector.broadcast %cst_18 : f32 to vector<8x1xf32>
    %57 = arith.divf %55, %56 : vector<8x1xf32>
    %58 = arith.mulf %52, %52 : vector<8x1xf32>
    %59 = arith.subf %57, %58 : vector<8x1xf32>
    %cst_19 = arith.constant 0.000000e+00 : f32
    %60 = vector.broadcast %cst_19 : f32 to vector<8x1xf32>
    %61 = arith.maximumf %59, %60 : vector<8x1xf32>
    %62 = vector.broadcast %52 : vector<8x1xf32> to vector<8x32xf32>
    %63 = arith.subf %48, %62 : vector<8x32xf32>
    %cst_20 = arith.constant 9.99999974E-6 : f32
    %64 = vector.broadcast %cst_20 : f32 to vector<8x1xf32>
    %65 = arith.addf %61, %64 : vector<8x1xf32>
    %66 = math.rsqrt %65 : vector<8x1xf32>
    %67 = vector.broadcast %66 : vector<8x1xf32> to vector<8x32xf32>
    %68 = arith.mulf %63, %67 : vector<8x32xf32>
    %69 = vector.broadcast %8 : vector<1x32xf32> to vector<8x32xf32>
    %70 = arith.mulf %68, %69 : vector<8x32xf32>
    %71 = vector.broadcast %9 : vector<1x32xf32> to vector<8x32xf32>
    %72 = arith.addf %70, %71 : vector<8x32xf32>
    %cst_21 = arith.constant 0.000000e+00 : f32
    %73 = vector.broadcast %cst_21 : f32 to vector<8x32xf32>
    %74 = arith.maximumf %72, %73 : vector<8x32xf32>
    %75 = arith.addf %74, %18 : vector<8x32xf32>
    %c0_22 = arith.constant 0 : index
    %c0_23 = arith.constant 0 : index
    %76 = vector.load %arg5[%c0_22, %c0_23] : memref<32x32xbf16, #tpu.memory_space<vmem>>, vector<32x32xbf16>
    %c0_24 = arith.constant 0 : index
    %c0_25 = arith.constant 0 : index
    %77 = vector.load %arg6[%c0_24, %c0_25] : memref<32x32xbf16, #tpu.memory_space<vmem>>, vector<32x32xbf16>
    %78 = vector.extract_strided_slice %0 {offsets = [7, 0], sizes = [1, 32], strides = [1, 1]} : vector<24x128xf32> to vector<1x32xf32>
    %79 = vector.extract_strided_slice %0 {offsets = [8, 0], sizes = [1, 32], strides = [1, 1]} : vector<24x128xf32> to vector<1x32xf32>
    %80 = vector.extract_strided_slice %0 {offsets = [9, 0], sizes = [1, 32], strides = [1, 1]} : vector<24x128xf32> to vector<1x32xf32>
    %81 = vector.extract_strided_slice %0 {offsets = [10, 0], sizes = [1, 32], strides = [1, 1]} : vector<24x128xf32> to vector<1x32xf32>
    %82 = vector.extract_strided_slice %0 {offsets = [11, 0], sizes = [1, 32], strides = [1, 1]} : vector<24x128xf32> to vector<1x32xf32>
    %83 = vector.extract_strided_slice %0 {offsets = [12, 0], sizes = [1, 32], strides = [1, 1]} : vector<24x128xf32> to vector<1x32xf32>
    %84 = arith.truncf %75 : vector<8x32xf32> to vector<8x32xbf16>
    %cst_26 = arith.constant dense<0.000000e+00> : vector<8x32xf32>
    %85 = tpu.matmul %84, %76, %cst_26 {dimension_numbers = #tpu.dot_dimension_numbers<[1], [0], [0], [1], [0, 0, 1, 1], [], []>} : vector<8x32xbf16>, vector<32x32xbf16>, vector<8x32xf32> -> vector<8x32xf32>
    %86 = vector.broadcast %78 : vector<1x32xf32> to vector<8x32xf32>
    %87 = arith.addf %85, %86 : vector<8x32xf32>
    %cst_27 = arith.constant dense<0.000000e+00> : vector<8xf32>
    %88 = vector.multi_reduction <add>, %87, %cst_27 [1] : vector<8x32xf32> to vector<8xf32>
    %89 = vector.shape_cast %88 : vector<8xf32> to vector<8x1xf32>
    %cst_28 = arith.constant 3.200000e+01 : f32
    %90 = vector.broadcast %cst_28 : f32 to vector<8x1xf32>
    %91 = arith.divf %89, %90 : vector<8x1xf32>
    %92 = arith.mulf %87, %87 : vector<8x32xf32>
    %cst_29 = arith.constant dense<0.000000e+00> : vector<8xf32>
    %93 = vector.multi_reduction <add>, %92, %cst_29 [1] : vector<8x32xf32> to vector<8xf32>
    %94 = vector.shape_cast %93 : vector<8xf32> to vector<8x1xf32>
    %cst_30 = arith.constant 3.200000e+01 : f32
    %95 = vector.broadcast %cst_30 : f32 to vector<8x1xf32>
    %96 = arith.divf %94, %95 : vector<8x1xf32>
    %97 = arith.mulf %91, %91 : vector<8x1xf32>
    %98 = arith.subf %96, %97 : vector<8x1xf32>
    %cst_31 = arith.constant 0.000000e+00 : f32
    %99 = vector.broadcast %cst_31 : f32 to vector<8x1xf32>
    %100 = arith.maximumf %98, %99 : vector<8x1xf32>
    %101 = vector.broadcast %91 : vector<8x1xf32> to vector<8x32xf32>
    %102 = arith.subf %87, %101 : vector<8x32xf32>
    %cst_32 = arith.constant 9.99999974E-6 : f32
    %103 = vector.broadcast %cst_32 : f32 to vector<8x1xf32>
    %104 = arith.addf %100, %103 : vector<8x1xf32>
    %105 = math.rsqrt %104 : vector<8x1xf32>
    %106 = vector.broadcast %105 : vector<8x1xf32> to vector<8x32xf32>
    %107 = arith.mulf %102, %106 : vector<8x32xf32>
    %108 = vector.broadcast %79 : vector<1x32xf32> to vector<8x32xf32>
    %109 = arith.mulf %107, %108 : vector<8x32xf32>
    %110 = vector.broadcast %80 : vector<1x32xf32> to vector<8x32xf32>
    %111 = arith.addf %109, %110 : vector<8x32xf32>
    %cst_33 = arith.constant 0.000000e+00 : f32
    %112 = vector.broadcast %cst_33 : f32 to vector<8x32xf32>
    %113 = arith.maximumf %111, %112 : vector<8x32xf32>
    %114 = arith.truncf %113 : vector<8x32xf32> to vector<8x32xbf16>
    %cst_34 = arith.constant dense<0.000000e+00> : vector<8x32xf32>
    %115 = tpu.matmul %114, %77, %cst_34 {dimension_numbers = #tpu.dot_dimension_numbers<[1], [0], [0], [1], [0, 0, 1, 1], [], []>} : vector<8x32xbf16>, vector<32x32xbf16>, vector<8x32xf32> -> vector<8x32xf32>
    %116 = vector.broadcast %81 : vector<1x32xf32> to vector<8x32xf32>
    %117 = arith.addf %115, %116 : vector<8x32xf32>
    %cst_35 = arith.constant dense<0.000000e+00> : vector<8xf32>
    %118 = vector.multi_reduction <add>, %117, %cst_35 [1] : vector<8x32xf32> to vector<8xf32>
    %119 = vector.shape_cast %118 : vector<8xf32> to vector<8x1xf32>
    %cst_36 = arith.constant 3.200000e+01 : f32
    %120 = vector.broadcast %cst_36 : f32 to vector<8x1xf32>
    %121 = arith.divf %119, %120 : vector<8x1xf32>
    %122 = arith.mulf %117, %117 : vector<8x32xf32>
    %cst_37 = arith.constant dense<0.000000e+00> : vector<8xf32>
    %123 = vector.multi_reduction <add>, %122, %cst_37 [1] : vector<8x32xf32> to vector<8xf32>
    %124 = vector.shape_cast %123 : vector<8xf32> to vector<8x1xf32>
    %cst_38 = arith.constant 3.200000e+01 : f32
    %125 = vector.broadcast %cst_38 : f32 to vector<8x1xf32>
    %126 = arith.divf %124, %125 : vector<8x1xf32>
    %127 = arith.mulf %121, %121 : vector<8x1xf32>
    %128 = arith.subf %126, %127 : vector<8x1xf32>
    %cst_39 = arith.constant 0.000000e+00 : f32
    %129 = vector.broadcast %cst_39 : f32 to vector<8x1xf32>
    %130 = arith.maximumf %128, %129 : vector<8x1xf32>
    %131 = vector.broadcast %121 : vector<8x1xf32> to vector<8x32xf32>
    %132 = arith.subf %117, %131 : vector<8x32xf32>
    %cst_40 = arith.constant 9.99999974E-6 : f32
    %133 = vector.broadcast %cst_40 : f32 to vector<8x1xf32>
    %134 = arith.addf %130, %133 : vector<8x1xf32>
    %135 = math.rsqrt %134 : vector<8x1xf32>
    %136 = vector.broadcast %135 : vector<8x1xf32> to vector<8x32xf32>
    %137 = arith.mulf %132, %136 : vector<8x32xf32>
    %138 = vector.broadcast %82 : vector<1x32xf32> to vector<8x32xf32>
    %139 = arith.mulf %137, %138 : vector<8x32xf32>
    %140 = vector.broadcast %83 : vector<1x32xf32> to vector<8x32xf32>
    %141 = arith.addf %139, %140 : vector<8x32xf32>
    %cst_41 = arith.constant 0.000000e+00 : f32
    %142 = vector.broadcast %cst_41 : f32 to vector<8x32xf32>
    %143 = arith.maximumf %141, %142 : vector<8x32xf32>
    %144 = arith.addf %143, %75 : vector<8x32xf32>
    %c0_42 = arith.constant 0 : index
    %c0_43 = arith.constant 0 : index
    %145 = vector.load %arg7[%c0_42, %c0_43] : memref<32x32xbf16, #tpu.memory_space<vmem>>, vector<32x32xbf16>
    %c0_44 = arith.constant 0 : index
    %c0_45 = arith.constant 0 : index
    %146 = vector.load %arg8[%c0_44, %c0_45] : memref<32x32xbf16, #tpu.memory_space<vmem>>, vector<32x32xbf16>
    %147 = vector.extract_strided_slice %0 {offsets = [13, 0], sizes = [1, 32], strides = [1, 1]} : vector<24x128xf32> to vector<1x32xf32>
    %148 = vector.extract_strided_slice %0 {offsets = [14, 0], sizes = [1, 32], strides = [1, 1]} : vector<24x128xf32> to vector<1x32xf32>
    %149 = vector.extract_strided_slice %0 {offsets = [15, 0], sizes = [1, 32], strides = [1, 1]} : vector<24x128xf32> to vector<1x32xf32>
    %150 = vector.extract_strided_slice %0 {offsets = [16, 0], sizes = [1, 32], strides = [1, 1]} : vector<24x128xf32> to vector<1x32xf32>
    %151 = vector.extract_strided_slice %0 {offsets = [17, 0], sizes = [1, 32], strides = [1, 1]} : vector<24x128xf32> to vector<1x32xf32>
    %152 = vector.extract_strided_slice %0 {offsets = [18, 0], sizes = [1, 32], strides = [1, 1]} : vector<24x128xf32> to vector<1x32xf32>
    %153 = arith.truncf %144 : vector<8x32xf32> to vector<8x32xbf16>
    %cst_46 = arith.constant dense<0.000000e+00> : vector<8x32xf32>
    %154 = tpu.matmul %153, %145, %cst_46 {dimension_numbers = #tpu.dot_dimension_numbers<[1], [0], [0], [1], [0, 0, 1, 1], [], []>} : vector<8x32xbf16>, vector<32x32xbf16>, vector<8x32xf32> -> vector<8x32xf32>
    %155 = vector.broadcast %147 : vector<1x32xf32> to vector<8x32xf32>
    %156 = arith.addf %154, %155 : vector<8x32xf32>
    %cst_47 = arith.constant dense<0.000000e+00> : vector<8xf32>
    %157 = vector.multi_reduction <add>, %156, %cst_47 [1] : vector<8x32xf32> to vector<8xf32>
    %158 = vector.shape_cast %157 : vector<8xf32> to vector<8x1xf32>
    %cst_48 = arith.constant 3.200000e+01 : f32
    %159 = vector.broadcast %cst_48 : f32 to vector<8x1xf32>
    %160 = arith.divf %158, %159 : vector<8x1xf32>
    %161 = arith.mulf %156, %156 : vector<8x32xf32>
    %cst_49 = arith.constant dense<0.000000e+00> : vector<8xf32>
    %162 = vector.multi_reduction <add>, %161, %cst_49 [1] : vector<8x32xf32> to vector<8xf32>
    %163 = vector.shape_cast %162 : vector<8xf32> to vector<8x1xf32>
    %cst_50 = arith.constant 3.200000e+01 : f32
    %164 = vector.broadcast %cst_50 : f32 to vector<8x1xf32>
    %165 = arith.divf %163, %164 : vector<8x1xf32>
    %166 = arith.mulf %160, %160 : vector<8x1xf32>
    %167 = arith.subf %165, %166 : vector<8x1xf32>
    %cst_51 = arith.constant 0.000000e+00 : f32
    %168 = vector.broadcast %cst_51 : f32 to vector<8x1xf32>
    %169 = arith.maximumf %167, %168 : vector<8x1xf32>
    %170 = vector.broadcast %160 : vector<8x1xf32> to vector<8x32xf32>
    %171 = arith.subf %156, %170 : vector<8x32xf32>
    %cst_52 = arith.constant 9.99999974E-6 : f32
    %172 = vector.broadcast %cst_52 : f32 to vector<8x1xf32>
    %173 = arith.addf %169, %172 : vector<8x1xf32>
    %174 = math.rsqrt %173 : vector<8x1xf32>
    %175 = vector.broadcast %174 : vector<8x1xf32> to vector<8x32xf32>
    %176 = arith.mulf %171, %175 : vector<8x32xf32>
    %177 = vector.broadcast %148 : vector<1x32xf32> to vector<8x32xf32>
    %178 = arith.mulf %176, %177 : vector<8x32xf32>
    %179 = vector.broadcast %149 : vector<1x32xf32> to vector<8x32xf32>
    %180 = arith.addf %178, %179 : vector<8x32xf32>
    %cst_53 = arith.constant 0.000000e+00 : f32
    %181 = vector.broadcast %cst_53 : f32 to vector<8x32xf32>
    %182 = arith.maximumf %180, %181 : vector<8x32xf32>
    %183 = arith.truncf %182 : vector<8x32xf32> to vector<8x32xbf16>
    %cst_54 = arith.constant dense<0.000000e+00> : vector<8x32xf32>
    %184 = tpu.matmul %183, %146, %cst_54 {dimension_numbers = #tpu.dot_dimension_numbers<[1], [0], [0], [1], [0, 0, 1, 1], [], []>} : vector<8x32xbf16>, vector<32x32xbf16>, vector<8x32xf32> -> vector<8x32xf32>
    %185 = vector.broadcast %150 : vector<1x32xf32> to vector<8x32xf32>
    %186 = arith.addf %184, %185 : vector<8x32xf32>
    %cst_55 = arith.constant dense<0.000000e+00> : vector<8xf32>
    %187 = vector.multi_reduction <add>, %186, %cst_55 [1] : vector<8x32xf32> to vector<8xf32>
    %188 = vector.shape_cast %187 : vector<8xf32> to vector<8x1xf32>
    %cst_56 = arith.constant 3.200000e+01 : f32
    %189 = vector.broadcast %cst_56 : f32 to vector<8x1xf32>
    %190 = arith.divf %188, %189 : vector<8x1xf32>
    %191 = arith.mulf %186, %186 : vector<8x32xf32>
    %cst_57 = arith.constant dense<0.000000e+00> : vector<8xf32>
    %192 = vector.multi_reduction <add>, %191, %cst_57 [1] : vector<8x32xf32> to vector<8xf32>
    %193 = vector.shape_cast %192 : vector<8xf32> to vector<8x1xf32>
    %cst_58 = arith.constant 3.200000e+01 : f32
    %194 = vector.broadcast %cst_58 : f32 to vector<8x1xf32>
    %195 = arith.divf %193, %194 : vector<8x1xf32>
    %196 = arith.mulf %190, %190 : vector<8x1xf32>
    %197 = arith.subf %195, %196 : vector<8x1xf32>
    %cst_59 = arith.constant 0.000000e+00 : f32
    %198 = vector.broadcast %cst_59 : f32 to vector<8x1xf32>
    %199 = arith.maximumf %197, %198 : vector<8x1xf32>
    %200 = vector.broadcast %190 : vector<8x1xf32> to vector<8x32xf32>
    %201 = arith.subf %186, %200 : vector<8x32xf32>
    %cst_60 = arith.constant 9.99999974E-6 : f32
    %202 = vector.broadcast %cst_60 : f32 to vector<8x1xf32>
    %203 = arith.addf %199, %202 : vector<8x1xf32>
    %204 = math.rsqrt %203 : vector<8x1xf32>
    %205 = vector.broadcast %204 : vector<8x1xf32> to vector<8x32xf32>
    %206 = arith.mulf %201, %205 : vector<8x32xf32>
    %207 = vector.broadcast %151 : vector<1x32xf32> to vector<8x32xf32>
    %208 = arith.mulf %206, %207 : vector<8x32xf32>
    %209 = vector.broadcast %152 : vector<1x32xf32> to vector<8x32xf32>
    %210 = arith.addf %208, %209 : vector<8x32xf32>
    %cst_61 = arith.constant 0.000000e+00 : f32
    %211 = vector.broadcast %cst_61 : f32 to vector<8x32xf32>
    %212 = arith.maximumf %210, %211 : vector<8x32xf32>
    %213 = arith.addf %212, %144 : vector<8x32xf32>
    %214 = vector.extract_strided_slice %0 {offsets = [19, 0], sizes = [1, 32], strides = [1, 1]} : vector<24x128xf32> to vector<1x32xf32>
    %215 = vector.extract_strided_slice %0 {offsets = [20, 0], sizes = [1, 32], strides = [1, 1]} : vector<24x128xf32> to vector<1x32xf32>
    %216 = vector.extract_strided_slice %0 {offsets = [21, 0], sizes = [1, 128], strides = [1, 1]} : vector<24x128xf32> to vector<1x128xf32>
    %c0_62 = arith.constant 0 : index
    %c0_63 = arith.constant 0 : index
    %217 = vector.load %arg9[%c0_62, %c0_63] : memref<32x128xbf16, #tpu.memory_space<vmem>>, vector<32x128xbf16>
    %cst_64 = arith.constant dense<0.000000e+00> : vector<8xf32>
    %218 = vector.multi_reduction <add>, %213, %cst_64 [1] : vector<8x32xf32> to vector<8xf32>
    %219 = vector.shape_cast %218 : vector<8xf32> to vector<8x1xf32>
    %cst_65 = arith.constant 3.200000e+01 : f32
    %220 = vector.broadcast %cst_65 : f32 to vector<8x1xf32>
    %221 = arith.divf %219, %220 : vector<8x1xf32>
    %222 = arith.mulf %213, %213 : vector<8x32xf32>
    %cst_66 = arith.constant dense<0.000000e+00> : vector<8xf32>
    %223 = vector.multi_reduction <add>, %222, %cst_66 [1] : vector<8x32xf32> to vector<8xf32>
    %224 = vector.shape_cast %223 : vector<8xf32> to vector<8x1xf32>
    %cst_67 = arith.constant 3.200000e+01 : f32
    %225 = vector.broadcast %cst_67 : f32 to vector<8x1xf32>
    %226 = arith.divf %224, %225 : vector<8x1xf32>
    %227 = arith.mulf %221, %221 : vector<8x1xf32>
    %228 = arith.subf %226, %227 : vector<8x1xf32>
    %cst_68 = arith.constant 0.000000e+00 : f32
    %229 = vector.broadcast %cst_68 : f32 to vector<8x1xf32>
    %230 = arith.maximumf %228, %229 : vector<8x1xf32>
    %231 = vector.broadcast %221 : vector<8x1xf32> to vector<8x32xf32>
    %232 = arith.subf %213, %231 : vector<8x32xf32>
    %cst_69 = arith.constant 9.99999974E-6 : f32
    %233 = vector.broadcast %cst_69 : f32 to vector<8x1xf32>
    %234 = arith.addf %230, %233 : vector<8x1xf32>
    %235 = math.rsqrt %234 : vector<8x1xf32>
    %236 = vector.broadcast %235 : vector<8x1xf32> to vector<8x32xf32>
    %237 = arith.mulf %232, %236 : vector<8x32xf32>
    %238 = vector.broadcast %214 : vector<1x32xf32> to vector<8x32xf32>
    %239 = arith.mulf %237, %238 : vector<8x32xf32>
    %240 = vector.broadcast %215 : vector<1x32xf32> to vector<8x32xf32>
    %241 = arith.addf %239, %240 : vector<8x32xf32>
    %cst_70 = arith.constant 0.000000e+00 : f32
    %242 = vector.broadcast %cst_70 : f32 to vector<8x32xf32>
    %243 = arith.maximumf %241, %242 : vector<8x32xf32>
    %244 = arith.truncf %243 : vector<8x32xf32> to vector<8x32xbf16>
    %cst_71 = arith.constant dense<0.000000e+00> : vector<8x128xf32>
    %245 = tpu.matmul %244, %217, %cst_71 {dimension_numbers = #tpu.dot_dimension_numbers<[1], [0], [0], [1], [0, 0, 1, 1], [], []>} : vector<8x32xbf16>, vector<32x128xbf16>, vector<8x128xf32> -> vector<8x128xf32>
    %246 = vector.broadcast %216 : vector<1x128xf32> to vector<8x128xf32>
    %247 = arith.addf %245, %246 : vector<8x128xf32>
    %c0_72 = arith.constant 0 : index
    %c0_73 = arith.constant 0 : index
    %248 = vector.load %arg10[%c0_72, %c0_73] : memref<8x128xf32, #tpu.memory_space<vmem>>, vector<8x128xf32>
    tpu.vector_store %arg10[%c0_72, %c0_73], %247 {strides = array<i32>} : memref<8x128xf32, #tpu.memory_space<vmem>>, vector<8x128xf32>,
    return
  }
  func.func @transform_0(%arg0: i32) -> (i32, i32) {
    %c0_i32 = arith.constant 0 : i32
    %c0_i32_0 = arith.constant 0 : i32
    return %arg0, %c0_i32 : i32, i32
  }
  func.func @transform_1(%arg0: i32) -> (i32, i32) {
    %c0_i32 = arith.constant 0 : i32
    %c0_i32_0 = arith.constant 0 : i32
    %c0_i32_1 = arith.constant 0 : i32
    return %c0_i32, %c0_i32_0 : i32, i32
  }
  func.func @transform_2(%arg0: i32) -> (i32, i32) {
    %c0_i32 = arith.constant 0 : i32
    %c0_i32_0 = arith.constant 0 : i32
    %c0_i32_1 = arith.constant 0 : i32
    return %c0_i32, %c0_i32_0 : i32, i32
  }
  func.func @transform_3(%arg0: i32) -> (i32, i32) {
    %c0_i32 = arith.constant 0 : i32
    %c0_i32_0 = arith.constant 0 : i32
    %c0_i32_1 = arith.constant 0 : i32
    return %c0_i32, %c0_i32_0 : i32, i32
  }
  func.func @transform_4(%arg0: i32) -> (i32, i32) {
    %c0_i32 = arith.constant 0 : i32
    %c0_i32_0 = arith.constant 0 : i32
    %c0_i32_1 = arith.constant 0 : i32
    return %c0_i32, %c0_i32_0 : i32, i32
  }
  func.func @transform_5(%arg0: i32) -> (i32, i32) {
    %c0_i32 = arith.constant 0 : i32
    %c0_i32_0 = arith.constant 0 : i32
    %c0_i32_1 = arith.constant 0 : i32
    return %c0_i32, %c0_i32_0 : i32, i32
  }
  func.func @transform_6(%arg0: i32) -> (i32, i32) {
    %c0_i32 = arith.constant 0 : i32
    %c0_i32_0 = arith.constant 0 : i32
    %c0_i32_1 = arith.constant 0 : i32
    return %c0_i32, %c0_i32_0 : i32, i32
  }
  func.func @transform_7(%arg0: i32) -> (i32, i32) {
    %c0_i32 = arith.constant 0 : i32
    %c0_i32_0 = arith.constant 0 : i32
    %c0_i32_1 = arith.constant 0 : i32
    return %c0_i32, %c0_i32_0 : i32, i32
  }
  func.func @transform_8(%arg0: i32) -> (i32, i32) {
    %c0_i32 = arith.constant 0 : i32
    %c0_i32_0 = arith.constant 0 : i32
    %c0_i32_1 = arith.constant 0 : i32
    return %c0_i32, %c0_i32_0 : i32, i32
  }
  func.func @transform_9(%arg0: i32) -> (i32, i32) {
    %c0_i32 = arith.constant 0 : i32
    %c0_i32_0 = arith.constant 0 : i32
    return %arg0, %c0_i32 : i32, i32
  }
}

</mosaic_0001>

<bundles_post_ra>
// kernel: resnet_forward.1
= control target key start
LH: loop header
LB: loop body
LE: loop exit
PB: predicated region body
PF: predicated region fallthrough
CT: control target
= control target key end

     0   :  { %s1326_s30 = smov 0   ;;  %s1559_s0 = inlined_call_operand.vmem [shape: f32[16,128], index: 0, kind: input, shape index: {}]   ;;  %s1560_s1 = inlined_call_operand.vmem [shape: f32[24,128], index: 1, kind: input, shape index: {}]   ;;  %s1561_s2 = inlined_call_operand.vmem [shape: bf16[128,64], index: 2, kind: input, shape index: {}]   ;;  %s1562_s3 = inlined_call_operand.vmem [shape: bf16[32,32], index: 3, kind: input, shape index: {}]   ;;  %s1563_s4 = inlined_call_operand.vmem [shape: bf16[32,32], index: 4, kind: input, shape index: {}]   ;;  %s1564_s5 = inlined_call_operand.vmem [shape: bf16[32,32], index: 5, kind: input, shape index: {}]   ;;  %s1565_s6 = inlined_call_operand.vmem [shape: bf16[32,32], index: 6, kind: input, shape index: {}]   ;;  %s1566_s7 = inlined_call_operand.vmem [shape: bf16[32,32], index: 7, kind: input, shape index: {}]   ;;  %s1567_s8 = inlined_call_operand.vmem [shape: bf16[32,128], index: 8, kind: input, shape index: {}]   ;;  %s1568_s9 = inlined_call_operand.vmem [shape: f32[16,128], index: 9, kind: output, shape index: {}]  }
   0x1 LB: > { %s1088_s10 = sadd.s32 4294967295, %s1270_s30   ;;  %p1092_p0 = scmp.ge.s32.totalorder %s1270_s30, 1  ;;  %s1270_s30 = sphi %s1326_s30, %s19_s30  }
   0x2   : > { %p286_p1 = scmp.lt.s32.totalorder %s1270_s30, 3 }
   0x4   : > { %p287_p2 = pnand %p1092_p0, %p286_p1 }
   0x5   : > { %v1230_v0 = vld [vmem:[%s1561_s2] sm:$0xff] (!%p287_p2)   ;;  %v442_v1 = vlaneseq (!%p287_p2)  ;;  %v1272_v2 = vmov (!%p287_p2), 0.0   ;;  %v1231_v3 = vld [vmem:[%s1561_s2 + $0x8] sm:$0xff] (!%p287_p2)   ;;  %vm1273_vm0 = vmmov (!%p287_p2), 0   ;;  %p320_p3 = scmp.lt.s32.totalorder (!%p287_p2), %s1088_s10, 1  ;;  %v1232_v6 = vld [vmem:[%s1561_s2 + $0x10] sm:$0xff] (!%p287_p2)  }
   0x6   : > { %290 = sbr.rel (%p287_p2) target bundleno = 2767 (0xacf), region = 56  ;;  %1150 = vmatprep.subr.bf16.mxu0 (!%p287_p2), %v1272_v2  ;;  %1170 = vmatprep.subr.bf16.mxu1 (!%p287_p2), %v1272_v2  ;;  %v1233_v7 = vld [vmem:[%s1561_s2 + $0x18] sm:$0xff] (!%p287_p2)   ;;  %v1362_v8 = vld [vmem:[%s1560_s1] sm:$0xff] (!%p287_p2)  ;;  %s1274_s21 = smov (!%p287_p2), 32   ;;  %v1235_v11 = vld [vmem:[%s1561_s2 + $0x28] sm:$0xff] (!%p287_p2)   ;;  %vm456_vm1 = vcmask (!%p287_p2), 261120  }
   0x7   : > { %1151 = vmatpush3.bf16.msra.mxu0 (!%p287_p2), %v1230_v0  ;;  %1166 = vmatprep.mubr.msk.bf16.mxu0 (!%p287_p2), %vm1273_vm0, %v1272_v2  ;;  %v1345_v4 = vshrl.u32 (!%p287_p2), %v442_v1, 7  ;;  %v1234_v10 = vld [vmem:[%s1561_s2 + $0x20] sm:$0xff] (!%p287_p2)   ;;  %v1236_v12 = vld [vmem:[%s1561_s2 + $0x30] sm:$0xff] (!%p287_p2)   ;;  %v1237_v13 = vld [vmem:[%s1561_s2 + $0x38] sm:$0xff] (!%p287_p2)   ;;  %s1275_s19 = smov (!%p287_p2), 96  }
   0x8   : > { %1152 = vmatprep.subr.bf16.mxu0 (!%p287_p2), %v1272_v2  ;;  %1174 = vmatprep.mubr.msk.bf16.mxu1 (!%p287_p2), %vm1273_vm0, %v1272_v2  ;;  %v1238_v26 = vld [vmem:[%s1562_s3] sm:$0xff] (!%p287_p2)   ;;  %v1239_v27 = vld [vmem:[%s1562_s3 + $0x8] sm:$0xff] (!%p287_p2)  }
   0x9   : > { %v449_v5 = vsub.s32 (!%p287_p2), 6, %v1345_v4  ;;  %v1394_v16 = vsub.s32 (!%p287_p2), 0, %v1345_v4  ;;  %1171 = vmatpush3.bf16.msra.mxu1 (!%p287_p2), %v1238_v26  ;;  %v1409_v36 = vsub.s32 (!%p287_p2), 1, %v1345_v4  ;;  %v1412_v37 = vsub.s32 (!%p287_p2), 2, %v1345_v4  ;;  %v1240_v59 = vld [vmem:[%s1563_s4] sm:$0xff] (!%p287_p2)   ;;  %v1241_v60 = vld [vmem:[%s1563_s4 + $0x8] sm:$0xff] (!%p287_p2)  }
   0xa   : > { %1172 = vmatprep.subr.bf16.mxu1 (!%p287_p2), %v1272_v2  ;;  %v1422_v47 = vsub.s32 (!%p287_p2), 3, %v1345_v4 }
   0xb   : > { %1153 = vmatpush3.bf16.msra.mxu0 (!%p287_p2), %v1231_v3  ;;  %v450_v9 = vrot.slane (!%p287_p2), %v1362_v8, %v449_v5  ;;  %v445_v17 = vrot.slane (!%p287_p2), %v1362_v8, %v1394_v16  ;;  %v477_v39 = vrot.slane (!%p287_p2), %v1362_v8, %v1409_v36  ;;  %v482_v42 = vrot.slane (!%p287_p2), %v1362_v8, %v1412_v37 }
   0xc   : > { %1154 = vmatprep.subr.bf16.mxu0 (!%p287_p2), %v1272_v2  ;;  %v489_v48 = vrot.slane (!%p287_p2), %v1362_v8, %v1422_v47 }
   0xd   : > { %s1570_s10 = smov (!%p320_p3, %s1088_s10), 1  ;;  %452 = vrot.lane.b32.xlu1 %v450_v9, %s1274_s21  ;;  %1173 = vmatpush3.bf16.msra.mxu1 %v1239_v27  ;;  %v1437_v9 = vsub.s32 4, %v1345_v4 }
   0xe   : > { %s1093_s26 = sshll.u32 %s1570_s10, 3  ;;  %1178 = vmatprep.subr.bf16.mxu1 %v1272_v2 }
   0xf   : > { %1155 = vmatpush3.bf16.msra.mxu0 %v1232_v6  ;;  %s323_s12 = scalar_lea.vmem %s1559_s0, %s1093_s26  ;;  %s327_s29 = scalar_lea.vmem %s1568_s9, %s1093_s26 }
  0x10   : > { %1156 = vmatprep.subr.bf16.mxu0 %v1272_v2  ;;  %v332_v14 = vld [vmem:[%s323_s12] sm:$0xff] }
  0x11   : > { %v353_v15 = vpack.c.bf16 %v332_v14, %v332_v14 }
  0x13   : > { %1157 = vmatpush3.bf16.msra.mxu0 %v1233_v7 }
  0x14   : > { %1158 = vmatprep.subr.bf16.mxu0 %v1272_v2 }
  0x17   : > { %1159 = vmatpush3.bf16.msra.mxu0 %v1234_v10  ;;  %v1440_v10 = vsub.s32 5, %v1345_v4 }
  0x18   : > { %1160 = vmatprep.subr.bf16.mxu0 %v1272_v2 }
  0x19   : > { %v569_v14 = vrot.slane %v1362_v8, %v1440_v10 }
  0x1b   : > { %1161 = vmatpush3.bf16.msra.mxu0 %v1235_v11 }
  0x1c   : > { %1162 = vmatprep.subr.bf16.mxu0 %v1272_v2 }
  0x1f   : > { %1163 = vmatpush3.bf16.msra.mxu0 %v1236_v12  ;;  %v564_v12 = vrot.slane %v1362_v8, %v1437_v9 }
  0x20   : > { %1164 = vmatprep.subr.bf16.mxu0 %v1272_v2 }
  0x23   : > { %1165 = vmatpush3.bf16.msra.mxu0 %v1237_v13 }
  0x24   : > { %1202 = vmatprep.subr.bf16.mxu0 %v1272_v2 }
  0x26   : > { %1167 = vmatmul.mubr.bf16.vlgmr.msra.gmra.mrb[0].mxu0 %v353_v15 }
  0x27   : > { %1206 = vmatprep.mubr.msk.bf16.mxu0 %vm1273_vm0, %v1272_v2 }
  0x7f   : > { %v453_v57 = vpop.permute.xlu1 %452 }
  0xf9   : > { %v436_v18 = vpop.f32.mrb[0].mxu0 }
  0xfa   : > { %v446_v19 = vadd.f32 %v445_v17, %v436_v18  ;;  %v1168_v20 = vpop.f32.mrb[1].mxu0  ;;  %v455_v58 = vadd.f32 %v453_v57, %v436_v18 }
  0xfb   : > { %v439_v21 = vpop.f32.mrb[2].mxu0 }
  0xfc   : > { %v1169_v22 = vpop.f32.mrb[3].mxu0  ;;  %v457_v23 = vsel %vm456_vm1, %v446_v19, 0.0  ;;  %v462_v24 = vmul.f32 %v446_v19, %v446_v19 }
  0xfd   : > { %458 = vadd.xlane.f32.xlu0 %v457_v23  ;;  %v588_v23 = vsub.s32 7, %v1345_v4 }
  0xfe   : > { %v463_v25 = vsel %vm456_vm1, %v462_v24, 0.0 }
  0xff   : > { %v589_v24 = vrot.slane %v1362_v8, %v588_v23  ;;  %v1243_v8 = vld [vmem:[%s1564_s5 + $0x8] sm:$0xff]  }
 0x101   : > { %464 = vadd.xlane.f32.xlu0 %v463_v25 }
 0x18a   : > { %v459_v28 = vpop.xlane.xlu0 %458 }
 0x18b   : > { %v461_v29 = vmul.f32 0.03125, %v459_v28 }
 0x18d   : > { %v467_v31 = vmul.f32 %v461_v29, %v461_v29  ;;  %v470_v38 = vsub.f32 %v446_v19, %v461_v29 }
 0x18e   : > { %v465_v30 = vpop.xlane.xlu0 %464 }
 0x18f   : > { %v466_v32 = vmul.f32 0.03125, %v465_v30 }
 0x191   : > { %v468_v33 = vsub.f32 %v466_v32, %v467_v31 }
 0x193   : > { %v469_v34 = vmax.f32 %v468_v33, 0.0  ;;  %v1242_v33 = vld [vmem:[%s1564_s5] sm:$0xff]  }
 0x195   : > { %v471_v35 = vadd.f32 1e-05, %v469_v34 }
 0x197   : > { %1250 = vrsqrt.f32 %v471_v35 }
 0x1a1   : > { %v1251_v40 = vpop.eup %1250 }
 0x1a2   : > { %v473_v41 = vmul.f32 %v1251_v40, %v470_v38 }
 0x1a4   : > { %v478_v43 = vmul.f32 %v477_v39, %v473_v41 }
 0x1a6   : > { %v483_v44 = vadd.f32 %v482_v42, %v478_v43 }
 0x1a8   : > { %v484_v45 = vmax.f32 %v483_v44, 0.0  ;;  %v1470_v44 = vld [vmem:[%s1560_s1 + $0x8] sm:$0xff] }
 0x1aa   : > { %v485_v46 = vpack.c.bf16 %v484_v45, %v484_v45  ;;  %v664_v45 = vrot.slane %v1470_v44, %v1394_v16 }
 0x1ac   : > { %1175 = vmatmul.mubr.msk.bf16.vlgmr.msra.gmra.mrb[0].mxu1 %vm456_vm1, %v485_v46 }
 0x1ad   : > { %1182 = vmatprep.mubr.msk.bf16.mxu1 %vm1273_vm0, %v1272_v2  ;;  %1179 = vmatpush3.bf16.msra.mxu1 %v1240_v59 }
 0x1ae   : > { %1180 = vmatprep.subr.bf16.mxu1 %v1272_v2 }
 0x1b1   : > { %1181 = vmatpush3.bf16.msra.mxu1 %v1241_v60 }
 0x1b2   : > { %1186 = vmatprep.subr.bf16.mxu1 %v1272_v2 }
 0x27f   : > { %v539_v49 = vpop.f32.mrb[0].mxu1 }
 0x280   : > { %v540_v50 = vadd.f32 %v539_v49, %v489_v48  ;;  %v1176_v51 = vpop.f32.mrb[1].mxu1 }
 0x281   : > { %v542_v52 = vpop.f32.mrb[2].mxu1 }
 0x282   : > { %v1177_v53 = vpop.f32.mrb[3].mxu1  ;;  %v545_v54 = vsel %vm456_vm1, %v540_v50, 0.0  ;;  %v549_v55 = vmul.f32 %v540_v50, %v540_v50 }
 0x283   : > { %546 = vadd.xlane.f32.xlu1 %v545_v54 }
 0x284   : > { %v550_v56 = vsel %vm456_vm1, %v549_v55, 0.0  ;;  %v676_v55 = vrot.slane %v1470_v44, %v1412_v37 }
 0x285   : > { %551 = vadd.xlane.f32.xlu0 %v550_v56 }
 0x29b   : > { %573 = vrot.lane.b32.xlu0 %v455_v58, %s1275_s19 }
 0x310   : > { %v547_v61 = vpop.xlane.xlu1 %546 }
 0x311   : > { %v548_v62 = vmul.f32 0.03125, %v547_v61 }
 0x312   : > { %v552_v63 = vpop.xlane.xlu0 %551 }
 0x313   : > { %v554_v0 = vmul.f32 %v548_v62, %v548_v62  ;;  %v553_v1 = vmul.f32 0.03125, %v552_v63  ;;  %v557_v11 = vsub.f32 %v540_v50, %v548_v62  ;;  %v669_v50 = vrot.slane %v1470_v44, %v1409_v36 }
 0x315   : > { %v555_v3 = vsub.f32 %v553_v1, %v554_v0  ;;  %v1244_v0 = vld [vmem:[%s1565_s6] sm:$0xff]   ;;  %v1245_v1 = vld [vmem:[%s1565_s6 + $0x8] sm:$0xff]  }
 0x316   : > { %v574_v20 = vpop.permute.xlu0 %573 }
 0x317   : > { %v556_v6 = vmax.f32 %v555_v3, 0.0 }
 0x319   : > { %v558_v7 = vadd.f32 1e-05, %v556_v6 }
 0x31b   : > { %1252 = vrsqrt.f32 %v558_v7 }
 0x325   : > { %v1253_v13 = vpop.eup %1252 }
 0x326   : > { %v560_v15 = vmul.f32 %v1253_v13, %v557_v11 }
 0x328   : > { %v565_v17 = vmul.f32 %v564_v12, %v560_v15 }
 0x32a   : > { %v570_v18 = vadd.f32 %v569_v14, %v565_v17  ;;  %v751_v17 = vrot.slane %v1470_v44, %v1422_v47 }
 0x32c   : > { %v571_v19 = vmax.f32 %v570_v18, 0.0 }
 0x32e   : > { %v1446_v21 = vadd.f32 %v574_v20, %v571_v19  ;;  %v756_v20 = vrot.slane %v1470_v44, %v1437_v9 }
 0x330   : > { %v585_v22 = vpack.c.bf16 %v1446_v21, %v1446_v21 }
 0x332   : > { %1183 = vmatmul.mubr.msk.bf16.vlgmr.msra.gmra.mrb[4].mxu1 %vm456_vm1, %v585_v22 }
 0x333   : > { %1190 = vmatprep.mubr.msk.bf16.mxu1 %vm1273_vm0, %v1272_v2  ;;  %1187 = vmatpush3.bf16.msra.mxu1 %v1242_v33 }
 0x334   : > { %1188 = vmatprep.subr.bf16.mxu1 %v1272_v2 }
 0x337   : > { %1189 = vmatpush3.bf16.msra.mxu1 %v1243_v8 }
 0x338   : > { %1194 = vmatprep.subr.bf16.mxu1 %v1272_v2 }
 0x405   : > { %v639_v25 = vpop.f32.mrb[4].mxu1 }
 0x406   : > { %v640_v26 = vadd.f32 %v639_v25, %v589_v24  ;;  %v1184_v27 = vpop.f32.mrb[5].mxu1 }
 0x407   : > { %v642_v28 = vpop.f32.mrb[6].mxu1 }
 0x408   : > { %v1185_v29 = vpop.f32.mrb[7].mxu1  ;;  %v645_v30 = vsel %vm456_vm1, %v640_v26, 0.0  ;;  %v649_v31 = vmul.f32 %v640_v26, %v640_v26 }
 0x409   : > { %646 = vadd.xlane.f32.xlu0 %v645_v30  ;;  %v772_v29 = vrot.slane %v1470_v44, %v1440_v10 }
 0x40a   : > { %v650_v32 = vsel %vm456_vm1, %v649_v31, 0.0 }
 0x40b   : > { %651 = vadd.xlane.f32.xlu1 %v650_v32 }
 0x496   : > { %v647_v34 = vpop.xlane.xlu0 %646 }
 0x497   : > { %v648_v35 = vmul.f32 0.03125, %v647_v34 }
 0x498   : > { %v652_v38 = vpop.xlane.xlu1 %651 }
 0x499   : > { %v654_v39 = vmul.f32 %v648_v35, %v648_v35  ;;  %v653_v40 = vmul.f32 0.03125, %v652_v38  ;;  %v657_v46 = vsub.f32 %v640_v26, %v648_v35  ;;  %v1246_v38 = vld [vmem:[%s1566_s7] sm:$0xff]  }
 0x49a   : > { %1203 = vmatpush3.bf16.msra.mxu0 %v1246_v38 }
 0x49b   : > { %v655_v41 = vsub.f32 %v653_v40, %v654_v39  ;;  %v1247_v39 = vld [vmem:[%s1566_s7 + $0x8] sm:$0xff]   ;;  %1204 = vmatprep.subr.bf16.mxu0 %v1272_v2 }
 0x49d   : > { %v656_v42 = vmax.f32 %v655_v41, 0.0 }
 0x49e   : > { %1205 = vmatpush3.bf16.msra.mxu0 %v1247_v39 }
 0x49f   : > { %v658_v43 = vadd.f32 1e-05, %v656_v42 }
 0x4a1   : > { %1254 = vrsqrt.f32 %v658_v43 }
 0x4ab   : > { %v1255_v48 = vpop.eup %1254 }
 0x4ac   : > { %v660_v49 = vmul.f32 %v1255_v48, %v657_v46 }
 0x4ae   : > { %v665_v51 = vmul.f32 %v664_v45, %v660_v49 }
 0x4b0   : > { %v670_v52 = vadd.f32 %v669_v50, %v665_v51  ;;  %v847_v50 = vrot.slane %v1470_v44, %v449_v5 }
 0x4b2   : > { %v671_v53 = vmax.f32 %v670_v52, 0.0 }
 0x4b4   : > { %v672_v54 = vpack.c.bf16 %v671_v53, %v671_v53  ;;  %v852_v53 = vrot.slane %v1470_v44, %v588_v23 }
 0x4b6   : > { %1191 = vmatmul.mubr.msk.bf16.vlgmr.msra.gmra.mrb[8].mxu1 %vm456_vm1, %v672_v54 }
 0x4b7   : > { %1198 = vmatprep.mubr.msk.bf16.mxu1 %vm1273_vm0, %v1272_v2  ;;  %1195 = vmatpush3.bf16.msra.mxu1 %v1244_v0 }
 0x4b8   : > { %1196 = vmatprep.subr.bf16.mxu1 %v1272_v2 }
 0x4bb   : > { %1197 = vmatpush3.bf16.msra.mxu1 %v1245_v1 }
 0x4bc   : > { %1210 = vmatprep.subr.bf16.mxu1 %v1272_v2 }
 0x589   : > { %v726_v56 = vpop.f32.mrb[8].mxu1 }
 0x58a   : > { %v727_v57 = vadd.f32 %v726_v56, %v676_v55  ;;  %v1192_v58 = vpop.f32.mrb[9].mxu1 }
 0x58b   : > { %v729_v59 = vpop.f32.mrb[10].mxu1 }
 0x58c   : > { %v1193_v60 = vpop.f32.mrb[11].mxu1  ;;  %v732_v61 = vsel %vm456_vm1, %v727_v57, 0.0  ;;  %v736_v62 = vmul.f32 %v727_v57, %v727_v57  ;;  %v1524_v59 = vld [vmem:[%s1560_s1 + $0x10] sm:$0xff] }
 0x58d   : > { %733 = vadd.xlane.f32.xlu1 %v732_v61  ;;  %v859_v5 = vrot.slane %v1524_v59, %v1394_v16 }
 0x58e   : > { %v737_v63 = vsel %vm456_vm1, %v736_v62, 0.0 }
 0x591   : > { %738 = vadd.xlane.f32.xlu1 %v737_v63 }
 0x61a   : > { %v734_v3 = vpop.xlane.xlu1 %733 }
 0x61b   : > { %v735_v6 = vmul.f32 0.03125, %v734_v3 }
 0x61d   : > { %v741_v11 = vmul.f32 %v735_v6, %v735_v6  ;;  %v744_v18 = vsub.f32 %v727_v57, %v735_v6 }
 0x61e   : > { %v739_v7 = vpop.xlane.xlu1 %738 }
 0x61f   : > { %v740_v12 = vmul.f32 0.03125, %v739_v7 }
 0x621   : > { %v742_v13 = vsub.f32 %v740_v12, %v741_v11 }
 0x623   : > { %v743_v14 = vmax.f32 %v742_v13, 0.0 }
 0x625   : > { %v745_v15 = vadd.f32 1e-05, %v743_v14 }
 0x627   : > { %1256 = vrsqrt.f32 %v745_v15  ;;  %v934_v15 = vrot.slane %v1524_v59, %v1409_v36  ;;  %v1248_v36 = vld [vmem:[%s1567_s8] sm:$0xff]  }
 0x631   : > { %v1257_v19 = vpop.eup %1256 }
 0x632   : > { %v747_v22 = vmul.f32 %v1257_v19, %v744_v18  ;;  %v939_v19 = vrot.slane %v1524_v59, %v1412_v37  ;;  %v1249_v37 = vld [vmem:[%s1567_s8 + $0x8] sm:$0xff]  }
 0x634   : > { %v752_v24 = vmul.f32 %v751_v17, %v747_v22 }
 0x636   : > { %v757_v25 = vadd.f32 %v756_v20, %v752_v24 }
 0x638   : > { %v758_v26 = vmax.f32 %v757_v25, 0.0 }
 0x63a   : > { %v1496_v27 = vadd.f32 %v758_v26, %v1446_v21 }
 0x63c   : > { %v768_v28 = vpack.c.bf16 %v1496_v27, %v1496_v27 }
 0x63e   : > { %1199 = vmatmul.mubr.msk.bf16.vlgmr.msra.gmra.mrb[12].mxu1 %vm456_vm1, %v768_v28 }
 0x63f   : > { %1214 = vmatprep.mubr.msk.bf16.mxu1 %vm1273_vm0, %v1272_v2  ;;  %1211 = vmatpush3.bf16.msra.mxu1 %v1248_v36 }
 0x640   : > { %1212 = vmatprep.subr.bf16.mxu1 %v1272_v2  ;;  %v971_v2 = vrot.slane %v1524_v59, %v1437_v9 }
 0x643   : > { %1213 = vmatpush3.bf16.msra.mxu1 %v1249_v37 }
 0x711   : > { %v822_v30 = vpop.f32.mrb[12].mxu1 }
 0x712   : > { %v823_v31 = vadd.f32 %v822_v30, %v772_v29  ;;  %v1200_v32 = vpop.f32.mrb[13].mxu1 }
 0x713   : > { %v825_v33 = vpop.f32.mrb[14].mxu1 }
 0x714   : > { %v1201_v8 = vpop.f32.mrb[15].mxu1  ;;  %v828_v34 = vsel %vm456_vm1, %v823_v31, 0.0  ;;  %v832_v21 = vmul.f32 %v823_v31, %v823_v31 }
 0x715   : > { %829 = vadd.xlane.f32.xlu1 %v828_v34 }
 0x716   : > { %v833_v35 = vsel %vm456_vm1, %v832_v21, 0.0 }
 0x719   : > { %834 = vadd.xlane.f32.xlu1 %v833_v35  ;;  %v966_v35 = vrot.slane %v1524_v59, %v1422_v47 }
 0x7a2   : > { %v830_v40 = vpop.xlane.xlu1 %829 }
 0x7a3   : > { %v831_v41 = vmul.f32 0.03125, %v830_v40 }
 0x7a5   : > { %v837_v43 = vmul.f32 %v831_v41, %v831_v41  ;;  %v840_v51 = vsub.f32 %v823_v31, %v831_v41 }
 0x7a6   : > { %v835_v42 = vpop.xlane.xlu1 %834 }
 0x7a7   : > { %v836_v45 = vmul.f32 0.03125, %v835_v42 }
 0x7a9   : > { %v838_v46 = vsub.f32 %v836_v45, %v837_v43 }
 0x7ab   : > { %v839_v48 = vmax.f32 %v838_v46, 0.0  ;;  %v978_v46 = vrot.slane %v1524_v59, %v1440_v10 }
 0x7ad   : > { %v841_v49 = vadd.f32 1e-05, %v839_v48 }
 0x7af   : > { %1258 = vrsqrt.f32 %v841_v49 }
 0x7b9   : > { %v1259_v52 = vpop.eup %1258 }
 0x7ba   : > { %v843_v54 = vmul.f32 %v1259_v52, %v840_v51 }
 0x7bc   : > { %v848_v55 = vmul.f32 %v847_v50, %v843_v54 }
 0x7be   : > { %v853_v56 = vadd.f32 %v852_v53, %v848_v55 }
 0x7c0   : > { %v854_v57 = vmax.f32 %v853_v56, 0.0 }
 0x7c2   : > { %v855_v58 = vpack.c.bf16 %v854_v57, %v854_v57 }
 0x7c4   : > { %1207 = vmatmul.mubr.msk.bf16.vlgmr.msra.gmra.mrb[4].mxu0 %vm456_vm1, %v855_v58 }
 0x897   : > { %v909_v60 = vpop.f32.mrb[4].mxu0 }
 0x898   : > { %v910_v61 = vadd.f32 %v909_v60, %v859_v5  ;;  %v1208_v4 = vpop.f32.mrb[5].mxu0 }
 0x899   : > { %v912_v62 = vpop.f32.mrb[6].mxu0 }
 0x89a   : > { %v1209_v23 = vpop.f32.mrb[7].mxu0  ;;  %v915_v44 = vsel %vm456_vm1, %v910_v61, 0.0  ;;  %v919_v63 = vmul.f32 %v910_v61, %v910_v61 }
 0x89b   : > { %916 = vadd.xlane.f32.xlu1 %v915_v44 }
 0x89c   : > { %v920_v0 = vsel %vm456_vm1, %v919_v63, 0.0 }
 0x89f   : > { %921 = vadd.xlane.f32.xlu1 %v920_v0 }
 0x928   : > { %v917_v1 = vpop.xlane.xlu1 %916 }
 0x929   : > { %v918_v3 = vmul.f32 0.03125, %v917_v1 }
 0x92b   : > { %v924_v7 = vmul.f32 %v918_v3, %v918_v3  ;;  %v927_v14 = vsub.f32 %v910_v61, %v918_v3 }
 0x92c   : > { %v922_v6 = vpop.xlane.xlu1 %921 }
 0x92d   : > { %v923_v11 = vmul.f32 0.03125, %v922_v6 }
 0x92f   : > { %v925_v12 = vsub.f32 %v923_v11, %v924_v7 }
 0x931   : > { %v926_v13 = vmax.f32 %v925_v12, 0.0 }
 0x933   : > { %v928_v16 = vadd.f32 1e-05, %v926_v13 }
 0x935   : > { %1260 = vrsqrt.f32 %v928_v16 }
 0x93f   : > { %v1261_v17 = vpop.eup %1260 }
 0x940   : > { %v930_v18 = vmul.f32 %v1261_v17, %v927_v14 }
 0x942   : > { %v935_v20 = vmul.f32 %v934_v15, %v930_v18 }
 0x944   : > { %v940_v22 = vadd.f32 %v939_v19, %v935_v20 }
 0x946   : > { %v941_v24 = vmax.f32 %v940_v22, 0.0 }
 0x948   : > { %v942_v25 = vadd.f32 %v941_v24, %v1496_v27 }
 0x94a   : > { %v947_v26 = vsel %vm456_vm1, %v942_v25, 0.0  ;;  %v951_v28 = vmul.f32 %v942_v25, %v942_v25 }
 0x94b   : > { %948 = vadd.xlane.f32.xlu0 %v947_v26 }
 0x94c   : > { %v952_v29 = vsel %vm456_vm1, %v951_v28, 0.0 }
 0x94d   : > { %953 = vadd.xlane.f32.xlu1 %v952_v29 }
 0x9d8   : > { %v949_v27 = vpop.xlane.xlu0 %948 }
 0x9d9   : > { %v950_v30 = vmul.f32 0.03125, %v949_v27 }
 0x9da   : > { %v954_v31 = vpop.xlane.xlu1 %953 }
 0x9db   : > { %v956_v32 = vmul.f32 %v950_v30, %v950_v30  ;;  %v955_v33 = vmul.f32 0.03125, %v954_v31  ;;  %v959_v38 = vsub.f32 %v942_v25, %v950_v30 }
 0x9dd   : > { %v957_v8 = vsub.f32 %v955_v33, %v956_v32 }
 0x9df   : > { %v958_v34 = vmax.f32 %v957_v8, 0.0 }
 0x9e1   : > { %v960_v21 = vadd.f32 1e-05, %v958_v34 }
 0x9e3   : > { %1262 = vrsqrt.f32 %v960_v21 }
 0x9ed   : > { %v1263_v39 = vpop.eup %1262 }
 0x9ee   : > { %v962_v40 = vmul.f32 %v1263_v39, %v959_v38 }
 0x9f0   : > { %v967_v41 = vmul.f32 %v966_v35, %v962_v40 }
 0x9f2   : > { %v972_v42 = vadd.f32 %v971_v2, %v967_v41 }
 0x9f4   : > { %v973_v43 = vmax.f32 %v972_v42, 0.0 }
 0x9f6   : > { %v974_v45 = vpack.c.bf16 %v973_v43, %v973_v43 }
 0x9f8   : > { %1215 = vmatmul.mubr.msk.bf16.vlgmr.msra.gmra.mrb[16].mxu1 %vm456_vm1, %v974_v45 }
 0xacb   : > { %v1028_v47 = vpop.f32.mrb[16].mxu1 }
 0xacc   : > { %v1029_v48 = vadd.f32 %v1028_v47, %v978_v46  ;;  %v1216_v49 = vpop.f32.mrb[17].mxu1 }
 0xacd   : > { %v1031_v50 = vpop.f32.mrb[18].mxu1 }
 0xace   : > { %1034 = vst [vmem:[%s327_s29] sm:$0xff] %v1029_v48  ;;  %v1217_v9 = vpop.f32.mrb[19].mxu1 }
 0xacf PF: > { %s19_s30 = sadd.s32 1, %s1270_s30  }
 0xad0   : > { %p16_p4 = scmp.ge.s32.totalorder %s19_s30, 4  }
 0xad2   :  { %18 = sbr.rel (!%p16_p4) target bundleno = 1 (0x1), region = 86 }

</bundles_post_ra>
